<compile_context>
chip_gen: v7x
topology: tpu7x:2x2x1
jax: 0.10.0
libtpu: 0.0.40
codegen_flags: <defaults>
</compile_context>

<pallas_src>
import jax
import jax.numpy as jnp
from jax.experimental import pallas as pl
from jax.experimental.pallas import tpu as pltpu


H1, H2, H3 = 256, 128, 64
H3_PAD = 128  # layer-3 output padded to a full lane group


def _round_up(x, m):
    return (x + m - 1) // m * m


# ----------------------------------------------------------------------------
# Pallas kernel: fused MLP forward for one batch tile
# ----------------------------------------------------------------------------
def testnet_kernel(
    pos_ref, info_ref,               # (TB, Dp) f32, (TB, Di) f32
    w1p_ref, w1i_ref, b1_ref,        # (Dp,256) bf16, (Di,256) bf16, (1,256) f32
    w2_ref, b2_ref,                  # (256,128) bf16, (1,128) f32
    w3_ref, b3_ref,                  # (128,128) bf16 (cols>=64 are 0), (1,128) f32
    wh_ref, bh_ref,                  # (128,HW) bf16 fused heads, (1,HW) f32
    head_ref,                        # (TB, HW) f32: [action | value | zero pad]
):
    pos = pos_ref[...].astype(jnp.bfloat16)
    info = info_ref[...].astype(jnp.bfloat16)

    # layer 1 — split-K matmul replaces the wrapper-side concat of pos/info
    h1 = (
        jnp.dot(pos, w1p_ref[...], preferred_element_type=jnp.float32)
        + jnp.dot(info, w1i_ref[...], preferred_element_type=jnp.float32)
        + b1_ref[...]
    )
    h1 = jnp.maximum(h1, 0.0).astype(jnp.bfloat16)

    # layer 2
    h2 = jnp.dot(h1, w2_ref[...], preferred_element_type=jnp.float32) + b2_ref[...]
    h2 = jnp.maximum(h2, 0.0).astype(jnp.bfloat16)

    # layer 3 (lane-padded to 128; padded bias is 0 so padded lanes stay 0)
    h3 = jnp.dot(h2, w3_ref[...], preferred_element_type=jnp.float32) + b3_ref[...]
    h3 = jnp.maximum(h3, 0.0).astype(jnp.bfloat16)

    # fused action/value head -> one lane-dense (TB, 128) store
    head = jnp.dot(h3, wh_ref[...], preferred_element_type=jnp.float32) + bh_ref[...]
    head_ref[...] = head.astype(head_ref.dtype)


# ----------------------------------------------------------------------------
# Parameter prep: fuse heads, pad layer 3, cast weights to bf16 (done once)
# ----------------------------------------------------------------------------
def prepare_params(params, pos_dim):
    w1, b1 = params["w1"], params["b1"]
    w2, b2 = params["w2"], params["b2"]
    w3, b3 = params["w3"], params["b3"]
    wm, bm = params["wm"], params["bm"]
    wv, bv = params["wv"], params["bv"]

    actions_num = wm.shape[1]
    head_w = max(128, _round_up(actions_num + 1, 128))

    # layer-3 weight/bias padded to 128 output lanes (padded bias must be 0)
    w3p = jnp.zeros((w3.shape[0], H3_PAD), jnp.float32).at[:, :H3].set(w3)
    b3p = jnp.zeros((1, H3_PAD), jnp.float32).at[:, :H3].set(b3)

    # fused [mean | value | 0-pad] head, K padded 64 -> 128 with zero rows
    wh = jnp.zeros((H3_PAD, head_w), jnp.float32)
    wh = wh.at[:H3, :actions_num].set(wm).at[:H3, actions_num].set(wv[:, 0])
    bh = jnp.zeros((1, head_w), jnp.float32)
    bh = bh.at[:, :actions_num].set(bm).at[:, actions_num].set(bv[:, 0])

    return dict(
        w1p=w1[:pos_dim].astype(jnp.bfloat16),
        w1i=w1[pos_dim:].astype(jnp.bfloat16),
        b1=b1.astype(jnp.float32),
        w2=w2.astype(jnp.bfloat16), b2=b2.astype(jnp.float32),
        w3=w3p.astype(jnp.bfloat16), b3=b3p,
        wh=wh.astype(jnp.bfloat16), bh=bh,
        actions_num=actions_num, head_w=head_w,
    )


# ----------------------------------------------------------------------------
# Wrapper: batch-tiled pallas_call mirroring TestNet.forward
# ----------------------------------------------------------------------------
def testnet_forward(obs, params, *, central_value=False, batch_tile=256):
    inner = obs["obs"]
    pos, info = inner["pos"], inner["info"]
    pos_dim, info_dim = pos.shape[-1], info.shape[-1]
    num_inputs = pos_dim + info_dim

    p = prepare_params(params, pos_dim)
    actions_num, head_w = p["actions_num"], p["head_w"]

    B = pos.shape[0]
    tb = min(batch_tile, _round_up(max(B, 1), 8))   # >=256 rows at rollout sizes
    bp = _round_up(B, tb)
    if bp != B:
        pad = ((0, bp - B), (0, 0))
        pos = jnp.pad(pos, pad)
        info = jnp.pad(info, pad)

    flops = 2 * bp * (num_inputs * H1 + H1 * H2 + H2 * H3_PAD + H3_PAD * head_w)
    weight_bytes = 2 * (num_inputs * H1 + H1 * H2 + H2 * H3_PAD + H3_PAD * head_w)
    bytes_accessed = 4 * bp * (num_inputs + head_w) + weight_bytes

    act_spec = lambda feat: pl.BlockSpec((tb, feat), lambda i: (i, 0))
    res_spec = lambda arr: pl.BlockSpec(arr.shape, lambda i: (0, 0))  # VMEM-resident

    head = pl.pallas_call(
        testnet_kernel,
        out_shape=jax.ShapeDtypeStruct((bp, head_w), jnp.float32),
        grid_spec=pltpu.PrefetchScalarGridSpec(
            num_scalar_prefetch=0,
            grid=(bp // tb,),
            in_specs=[
                act_spec(pos_dim),
                act_spec(info_dim),
                res_spec(p["w1p"]), res_spec(p["w1i"]), res_spec(p["b1"]),
                res_spec(p["w2"]), res_spec(p["b2"]),
                res_spec(p["w3"]), res_spec(p["b3"]),
                res_spec(p["wh"]), res_spec(p["bh"]),
            ],
            out_specs=pl.BlockSpec((tb, head_w), lambda i: (i, 0)),
        ),
        compiler_params=pltpu.CompilerParams(
            dimension_semantics=("parallel",),       # megacore-shard batch tiles
            vmem_limit_bytes=32 * 1024 * 1024,       # explicit cap (v7x-safe)
        ),
        cost_estimate=pl.CostEstimate(
            flops=flops, transcendentals=0, bytes_accessed=bytes_accessed
        ),
    )(
        pos, info,
        p["w1p"], p["w1i"], p["b1"],
        p["w2"], p["b2"],
        p["w3"], p["b3"],
        p["wh"], p["bh"],
    )

    action = head[:B, :actions_num]
    value = head[:B, actions_num:actions_num + 1]

    if central_value:
        return (value, None)
    return (action, value, None)


# ----------------------------------------------------------------------------
# Deterministic parameter construction (PyTorch-Linear-shaped, pre-transposed)
# ----------------------------------------------------------------------------
def make_params(key, num_inputs, actions_num):
    def linear(key, fan_in, fan_out):
        kw, kb = jax.random.split(key)
        bound = 1.0 / jnp.sqrt(jnp.float32(fan_in))
        w = jax.random.uniform(kw, (fan_in, fan_out), jnp.float32, -bound, bound)
        b = jax.random.uniform(kb, (1, fan_out), jnp.float32, -bound, bound)
        return w, b

    k1, k2, k3, km, kv = jax.random.split(key, 5)
    w1, b1 = linear(k1, num_inputs, H1)
    w2, b2 = linear(k2, H1, H2)
    w3, b3 = linear(k3, H2, H3)
    wm, bm = linear(km, H3, actions_num)
    wv, bv = linear(kv, H3, 1)
    return dict(w1=w1, b1=b1, w2=w2, b2=b2, w3=w3, b3=b3,
                wm=wm, bm=bm, wv=wv, bv=bv)


if __name__ == "__main__":
    key = jax.random.PRNGKey(0)
    k_pos, k_info, k_par = jax.random.split(key, 3)

    # input_shape = {'pos': (4,), 'info': (8,)}  ->  num_inputs = 12
    batch = 2
    pos_dim, info_dim = 4, 8
    num_inputs = pos_dim + info_dim
    actions_num = 8

    obs = {
        "obs": {
            "pos": jax.random.normal(k_pos, (batch, pos_dim), jnp.float32),
            "info": jax.random.normal(k_info, (batch, info_dim), jnp.float32),
        }
    }
    params = make_params(k_par, num_inputs, actions_num)

    action, value, state = testnet_forward(obs, params, central_value=False)
    jax.block_until_ready((action, value))

    # sanity check against a pure-JAX f32 reference (bf16 matmuls -> loose tol)
    x = jnp.concatenate([obs["obs"]["pos"], obs["obs"]["info"]], axis=-1)
    h = jnp.maximum(x @ params["w1"] + params["b1"], 0)
    h = jnp.maximum(h @ params["w2"] + params["b2"], 0)
    h = jnp.maximum(h @ params["w3"] + params["b3"], 0)
    ref_action = h @ params["wm"] + params["bm"]
    ref_value = h @ params["wv"] + params["bv"]

    assert action.shape == (batch, actions_num)
    assert value.shape == (batch, 1)
    assert state is None
    assert jnp.allclose(action, ref_action, atol=5e-2, rtol=5e-2)
    assert jnp.allclose(value, ref_value, atol=5e-2, rtol=5e-2)

    # also exercise the central_value branch
    cv_value, cv_state = testnet_forward(obs, params, central_value=True)
    jax.block_until_ready(cv_value)
    assert cv_value.shape == (batch, 1) and cv_state is None
    assert jnp.allclose(cv_value, ref_value, atol=5e-2, rtol=5e-2)

    print("KERNEL_OK")
</pallas_src>

<mosaic_0001>
module attributes {stable_mosaic.version = 11 : i64} {
  func.func @testnet_kernel(%arg0: i32, %arg1: memref<8x4xf32, #tpu.memory_space<vmem>>, %arg2: memref<8x8xf32, #tpu.memory_space<vmem>>, %arg3: memref<4x256xbf16, #tpu.memory_space<vmem>>, %arg4: memref<8x256xbf16, #tpu.memory_space<vmem>>, %arg5: memref<1x256xf32, #tpu.memory_space<vmem>>, %arg6: memref<256x128xbf16, #tpu.memory_space<vmem>>, %arg7: memref<1x128xf32, #tpu.memory_space<vmem>>, %arg8: memref<128x128xbf16, #tpu.memory_space<vmem>>, %arg9: memref<1x128xf32, #tpu.memory_space<vmem>>, %arg10: memref<128x128xbf16, #tpu.memory_space<vmem>>, %arg11: memref<1x128xf32, #tpu.memory_space<vmem>>, %arg12: memref<8x128xf32, #tpu.memory_space<vmem>>) attributes {dimension_semantics = [#tpu.dimension_semantics<parallel>], iteration_bounds = array<i64: 1>, scalar_prefetch = 0 : i64, scratch_operands = 0 : i64, tpu.core_type = #tpu.core_type<tc>, window_params = [{transform_indices = @transform_0, window_bounds = array<i64: 8, 4>}, {transform_indices = @transform_1, window_bounds = array<i64: 8, 8>}, {pipeline_mode = #tpu.pipeline_mode<synchronous>, transform_indices = @transform_2, window_bounds = array<i64: 4, 256>}, {pipeline_mode = #tpu.pipeline_mode<synchronous>, transform_indices = @transform_3, window_bounds = array<i64: 8, 256>}, {pipeline_mode = #tpu.pipeline_mode<synchronous>, transform_indices = @transform_4, window_bounds = array<i64: 1, 256>}, {pipeline_mode = #tpu.pipeline_mode<synchronous>, transform_indices = @transform_5, window_bounds = array<i64: 256, 128>}, {pipeline_mode = #tpu.pipeline_mode<synchronous>, transform_indices = @transform_6, window_bounds = array<i64: 1, 128>}, {pipeline_mode = #tpu.pipeline_mode<synchronous>, transform_indices = @transform_7, window_bounds = array<i64: 128, 128>}, {pipeline_mode = #tpu.pipeline_mode<synchronous>, transform_indices = @transform_8, window_bounds = array<i64: 1, 128>}, {pipeline_mode = #tpu.pipeline_mode<synchronous>, transform_indices = @transform_9, window_bounds = array<i64: 128, 128>}, {pipeline_mode = #tpu.pipeline_mode<synchronous>, transform_indices = @transform_10, window_bounds = array<i64: 1, 128>}, {transform_indices = @transform_11, window_bounds = array<i64: 8, 128>}]} {
    %c0 = arith.constant 0 : index
    %c0_0 = arith.constant 0 : index
    %0 = vector.load %arg1[%c0, %c0_0] : memref<8x4xf32, #tpu.memory_space<vmem>>, vector<8x4xf32>
    %1 = arith.truncf %0 : vector<8x4xf32> to vector<8x4xbf16>
    %c0_1 = arith.constant 0 : index
    %c0_2 = arith.constant 0 : index
    %2 = vector.load %arg2[%c0_1, %c0_2] : memref<8x8xf32, #tpu.memory_space<vmem>>, vector<8x8xf32>
    %3 = arith.truncf %2 : vector<8x8xf32> to vector<8x8xbf16>
    %c0_3 = arith.constant 0 : index
    %c0_4 = arith.constant 0 : index
    %4 = vector.load %arg3[%c0_3, %c0_4] : memref<4x256xbf16, #tpu.memory_space<vmem>>, vector<4x256xbf16>
    %cst = arith.constant dense<0.000000e+00> : vector<8x256xf32>
    %5 = tpu.matmul %1, %4, %cst {dimension_numbers = #tpu.dot_dimension_numbers<[1], [0], [0], [1], [0, 0, 1, 1], [], []>} : vector<8x4xbf16>, vector<4x256xbf16>, vector<8x256xf32> -> vector<8x256xf32>
    %c0_5 = arith.constant 0 : index
    %c0_6 = arith.constant 0 : index
    %6 = vector.load %arg4[%c0_5, %c0_6] : memref<8x256xbf16, #tpu.memory_space<vmem>>, vector<8x256xbf16>
    %cst_7 = arith.constant dense<0.000000e+00> : vector<8x256xf32>
    %7 = tpu.matmul %3, %6, %cst_7 {dimension_numbers = #tpu.dot_dimension_numbers<[1], [0], [0], [1], [0, 0, 1, 1], [], []>} : vector<8x8xbf16>, vector<8x256xbf16>, vector<8x256xf32> -> vector<8x256xf32>
    %8 = arith.addf %5, %7 : vector<8x256xf32>
    %c0_8 = arith.constant 0 : index
    %c0_9 = arith.constant 0 : index
    %9 = vector.load %arg5[%c0_8, %c0_9] : memref<1x256xf32, #tpu.memory_space<vmem>>, vector<1x256xf32>
    %10 = vector.broadcast %9 : vector<1x256xf32> to vector<8x256xf32>
    %11 = arith.addf %8, %10 : vector<8x256xf32>
    %cst_10 = arith.constant 0.000000e+00 : f32
    %12 = vector.broadcast %cst_10 : f32 to vector<8x256xf32>
    %13 = arith.maximumf %11, %12 : vector<8x256xf32>
    %14 = arith.truncf %13 : vector<8x256xf32> to vector<8x256xbf16>
    %c0_11 = arith.constant 0 : index
    %c0_12 = arith.constant 0 : index
    %15 = vector.load %arg6[%c0_11, %c0_12] : memref<256x128xbf16, #tpu.memory_space<vmem>>, vector<256x128xbf16>
    %cst_13 = arith.constant dense<0.000000e+00> : vector<8x128xf32>
    %16 = tpu.matmul %14, %15, %cst_13 {dimension_numbers = #tpu.dot_dimension_numbers<[1], [0], [0], [1], [0, 0, 1, 1], [], []>} : vector<8x256xbf16>, vector<256x128xbf16>, vector<8x128xf32> -> vector<8x128xf32>
    %c0_14 = arith.constant 0 : index
    %c0_15 = arith.constant 0 : index
    %17 = vector.load %arg7[%c0_14, %c0_15] : memref<1x128xf32, #tpu.memory_space<vmem>>, vector<1x128xf32>
    %18 = vector.broadcast %17 : vector<1x128xf32> to vector<8x128xf32>
    %19 = arith.addf %16, %18 : vector<8x128xf32>
    %cst_16 = arith.constant 0.000000e+00 : f32
    %20 = vector.broadcast %cst_16 : f32 to vector<8x128xf32>
    %21 = arith.maximumf %19, %20 : vector<8x128xf32>
    %22 = arith.truncf %21 : vector<8x128xf32> to vector<8x128xbf16>
    %c0_17 = arith.constant 0 : index
    %c0_18 = arith.constant 0 : index
    %23 = vector.load %arg8[%c0_17, %c0_18] : memref<128x128xbf16, #tpu.memory_space<vmem>>, vector<128x128xbf16>
    %cst_19 = arith.constant dense<0.000000e+00> : vector<8x128xf32>
    %24 = tpu.matmul %22, %23, %cst_19 {dimension_numbers = #tpu.dot_dimension_numbers<[1], [0], [0], [1], [0, 0, 1, 1], [], []>} : vector<8x128xbf16>, vector<128x128xbf16>, vector<8x128xf32> -> vector<8x128xf32>
    %c0_20 = arith.constant 0 : index
    %c0_21 = arith.constant 0 : index
    %25 = vector.load %arg9[%c0_20, %c0_21] : memref<1x128xf32, #tpu.memory_space<vmem>>, vector<1x128xf32>
    %26 = vector.broadcast %25 : vector<1x128xf32> to vector<8x128xf32>
    %27 = arith.addf %24, %26 : vector<8x128xf32>
    %cst_22 = arith.constant 0.000000e+00 : f32
    %28 = vector.broadcast %cst_22 : f32 to vector<8x128xf32>
    %29 = arith.maximumf %27, %28 : vector<8x128xf32>
    %30 = arith.truncf %29 : vector<8x128xf32> to vector<8x128xbf16>
    %c0_23 = arith.constant 0 : index
    %c0_24 = arith.constant 0 : index
    %31 = vector.load %arg10[%c0_23, %c0_24] : memref<128x128xbf16, #tpu.memory_space<vmem>>, vector<128x128xbf16>
    %cst_25 = arith.constant dense<0.000000e+00> : vector<8x128xf32>
    %32 = tpu.matmul %30, %31, %cst_25 {dimension_numbers = #tpu.dot_dimension_numbers<[1], [0], [0], [1], [0, 0, 1, 1], [], []>} : vector<8x128xbf16>, vector<128x128xbf16>, vector<8x128xf32> -> vector<8x128xf32>
    %c0_26 = arith.constant 0 : index
    %c0_27 = arith.constant 0 : index
    %33 = vector.load %arg11[%c0_26, %c0_27] : memref<1x128xf32, #tpu.memory_space<vmem>>, vector<1x128xf32>
    %34 = vector.broadcast %33 : vector<1x128xf32> to vector<8x128xf32>
    %35 = arith.addf %32, %34 : vector<8x128xf32>
    %c0_28 = arith.constant 0 : index
    %c0_29 = arith.constant 0 : index
    %36 = vector.load %arg12[%c0_28, %c0_29] : memref<8x128xf32, #tpu.memory_space<vmem>>, vector<8x128xf32>
    tpu.vector_store %arg12[%c0_28, %c0_29], %35 {strides = array<i32>} : memref<8x128xf32, #tpu.memory_space<vmem>>, vector<8x128xf32>,
    return
  }
  func.func @transform_0(%arg0: i32) -> (i32, i32) {
    %c0_i32 = arith.constant 0 : i32
    %c0_i32_0 = arith.constant 0 : i32
    return %arg0, %c0_i32 : i32, i32
  }
  func.func @transform_1(%arg0: i32) -> (i32, i32) {
    %c0_i32 = arith.constant 0 : i32
    %c0_i32_0 = arith.constant 0 : i32
    return %arg0, %c0_i32 : i32, i32
  }
  func.func @transform_2(%arg0: i32) -> (i32, i32) {
    %c0_i32 = arith.constant 0 : i32
    %c0_i32_0 = arith.constant 0 : i32
    %c0_i32_1 = arith.constant 0 : i32
    return %c0_i32, %c0_i32_0 : i32, i32
  }
  func.func @transform_3(%arg0: i32) -> (i32, i32) {
    %c0_i32 = arith.constant 0 : i32
    %c0_i32_0 = arith.constant 0 : i32
    %c0_i32_1 = arith.constant 0 : i32
    return %c0_i32, %c0_i32_0 : i32, i32
  }
  func.func @transform_4(%arg0: i32) -> (i32, i32) {
    %c0_i32 = arith.constant 0 : i32
    %c0_i32_0 = arith.constant 0 : i32
    %c0_i32_1 = arith.constant 0 : i32
    return %c0_i32, %c0_i32_0 : i32, i32
  }
  func.func @transform_5(%arg0: i32) -> (i32, i32) {
    %c0_i32 = arith.constant 0 : i32
    %c0_i32_0 = arith.constant 0 : i32
    %c0_i32_1 = arith.constant 0 : i32
    return %c0_i32, %c0_i32_0 : i32, i32
  }
  func.func @transform_6(%arg0: i32) -> (i32, i32) {
    %c0_i32 = arith.constant 0 : i32
    %c0_i32_0 = arith.constant 0 : i32
    %c0_i32_1 = arith.constant 0 : i32
    return %c0_i32, %c0_i32_0 : i32, i32
  }
  func.func @transform_7(%arg0: i32) -> (i32, i32) {
    %c0_i32 = arith.constant 0 : i32
    %c0_i32_0 = arith.constant 0 : i32
    %c0_i32_1 = arith.constant 0 : i32
    return %c0_i32, %c0_i32_0 : i32, i32
  }
  func.func @transform_8(%arg0: i32) -> (i32, i32) {
    %c0_i32 = arith.constant 0 : i32
    %c0_i32_0 = arith.constant 0 : i32
    %c0_i32_1 = arith.constant 0 : i32
    return %c0_i32, %c0_i32_0 : i32, i32
  }
  func.func @transform_9(%arg0: i32) -> (i32, i32) {
    %c0_i32 = arith.constant 0 : i32
    %c0_i32_0 = arith.constant 0 : i32
    %c0_i32_1 = arith.constant 0 : i32
    return %c0_i32, %c0_i32_0 : i32, i32
  }
  func.func @transform_10(%arg0: i32) -> (i32, i32) {
    %c0_i32 = arith.constant 0 : i32
    %c0_i32_0 = arith.constant 0 : i32
    %c0_i32_1 = arith.constant 0 : i32
    return %c0_i32, %c0_i32_0 : i32, i32
  }
  func.func @transform_11(%arg0: i32) -> (i32, i32) {
    %c0_i32 = arith.constant 0 : i32
    %c0_i32_0 = arith.constant 0 : i32
    return %arg0, %c0_i32 : i32, i32
  }
}

</mosaic_0001>

<bundles_post_ra>
// kernel: tpu_custom_call.1
= control target key start
LH: loop header
LB: loop body
LE: loop exit
PB: predicated region body
PF: predicated region fallthrough
CT: control target
= control target key end

     0   :  { %16 = vsyncpa [#allocation3], 0  ;;  %s1116_s0 = inlined_call_operand.vmem [shape: f32[8,4], index: 0, kind: input, shape index: {}]   ;;  %s1117_s1 = inlined_call_operand.vmem [shape: f32[8,8], index: 1, kind: input, shape index: {}]   ;;  %s1118_s2 = inlined_call_operand.hbm [shape: bf16[4,256], index: 2, kind: input, shape index: {}]   ;;  %s1119_s3 = inlined_call_operand.vmem [shape: bf16[8,256], index: 3, kind: input, shape index: {}]   ;;  %s1120_s4 = inlined_call_operand.vmem [shape: f32[1,256], index: 4, kind: input, shape index: {}]   ;;  %s1121_s5 = inlined_call_operand.hbm [shape: bf16[256,128], index: 5, kind: input, shape index: {}]   ;;  %s1122_s6 = inlined_call_operand.vmem [shape: f32[1,128], index: 6, kind: input, shape index: {}]   ;;  %s1123_s7 = inlined_call_operand.hbm [shape: bf16[128,128], index: 7, kind: input, shape index: {}]   ;;  %s1124_s8 = inlined_call_operand.vmem [shape: f32[1,128], index: 8, kind: input, shape index: {}]   ;;  %s1125_s9 = inlined_call_operand.hbm [shape: bf16[128,128], index: 9, kind: input, shape index: {}]   ;;  %s1126_s10 = inlined_call_operand.vmem [shape: f32[1,128], index: 10, kind: input, shape index: {}]   ;;  %s1127_s11 = inlined_call_operand.hbm [shape: f32[8,128], index: 11, kind: output, shape index: {}]  }
   0x1   :  { %17 = vsyncpa [#allocation6], 0 }
   0x2   :  { %18 = vsyncpa [#allocation9], 0 }
   0x3   :  { %19 = vsyncpa [#allocation4], 0  ;;  %s938_s17 = smov [#allocation5]   ;;  %s820_s21 = scalar_lea.hbm %s1121_s5, 2048 }
   0x4   :  { %s43_s18 = sshll.u32 %s938_s17, 4  ;;  %p821_p0 = scmp.ne.s32.totalorder %s1121_s5, %s820_s21  ;;  %s44_s18 = int_to_ptr.vmem [resolvable:$true] %s43_s18 }
   0x5   :  { %p824_p1 = scmp.lt.u32.totalorder %s820_s21, %s1121_s5 }
   0x7   :  { %p826_p2 = pnand %p824_p1, %p821_p0 }
   0x9   :  { %829 = shalt.err (!%p826_p2)
}
   0xa   :  { %s830_s26 = scalar_lea.vmem %s44_s18, 2048  ;;  %p835_p4 = scmp.lt.s32.totalorder %s44_s18, %s44_s18 }
   0xb   :  { %p831_p3 = scmp.ne.s32.totalorder %s44_s18, %s830_s26  ;;  %p836_p5 = scmp.lt.s32.totalorder %s830_s26, %s830_s26 }
   0xd   :  { %p837_p6 = por %p836_p5, %p835_p4 }
   0xf   :  { %p838_p7 = pnand %p837_p6, %p831_p3 }
  0x11   :  { %841 = shalt.err (!%p838_p7)
}
  0x12   :  { %s939_s27 = smov 64   ;;  %s940_s28 = smov 4  }
  0x13   :  { %49 = dma.hbm_to_vmem [thread:$0]  %s1121_s5, 2048, %s44_s18, [#allocation6], %s939_s27, %s939_s27, %s940_s28  }
  0x14   :  { %s941_s12 = smov [#allocation2]   ;;  %s942_s14 = smov [#allocation7]  }
  0x15   :  { %s30_s13 = sshll.u32 %s941_s12, 4  ;;  %s57_s15 = sshll.u32 %s942_s14, 4  ;;  %s31_s13 = int_to_ptr.vmem [resolvable:$true] %s30_s13  ;;  %s58_s15 = int_to_ptr.vmem [resolvable:$true] %s57_s15 }
  0x16   :  { %s842_s19 = scalar_lea.hbm %s1118_s2, 64 }
  0x17   :  { %p843_p8 = scmp.ne.s32.totalorder %s1118_s2, %s842_s19  ;;  %p846_p9 = scmp.lt.u32.totalorder %s842_s19, %s1118_s2 }
  0x19   :  { %p848_p10 = pnand %p846_p9, %p843_p8 }
  0x1b   :  { %851 = shalt.err (!%p848_p10)
}
  0x1c   :  { %s852_s5 = scalar_lea.vmem %s31_s13, 64  ;;  %p857_p12 = scmp.lt.s32.totalorder %s31_s13, %s31_s13 }
  0x1d   :  { %p853_p11 = scmp.ne.s32.totalorder %s31_s13, %s852_s5  ;;  %p858_p13 = scmp.lt.s32.totalorder %s852_s5, %s852_s5 }
  0x1f   :  { %p859_p0 = por %p858_p13, %p857_p12 }
  0x21   :  { %p860_p1 = pnand %p859_p0, %p853_p11 }
  0x23   :  { %863 = shalt.err (!%p860_p1)
}
  0x24   :  { %33 = dma.hbm_to_vmem [thread:$0]  %s1118_s2, 64, %s31_s13, [#allocation3]  }
  0x25   :  { %s864_s29 = scalar_lea.hbm %s1123_s7, 1024 }
  0x26   :  { %p865_p2 = scmp.ne.s32.totalorder %s1123_s7, %s864_s29  ;;  %p868_p3 = scmp.lt.u32.totalorder %s864_s29, %s1123_s7 }
  0x28   :  { %p870_p4 = pnand %p868_p3, %p865_p2 }
  0x2a   :  { %873 = shalt.err (!%p870_p4)
}
  0x2b   :  { %s874_s17 = scalar_lea.vmem %s58_s15, 1024  ;;  %p879_p6 = scmp.lt.s32.totalorder %s58_s15, %s58_s15 }
  0x2c   :  { %p875_p5 = scmp.ne.s32.totalorder %s58_s15, %s874_s17  ;;  %p880_p7 = scmp.lt.s32.totalorder %s874_s17, %s874_s17 }
  0x2e   :  { %p881_p8 = por %p880_p7, %p879_p6 }
  0x30   :  { %p882_p9 = pnand %p881_p8, %p875_p5 }
  0x32   :  { %885 = shalt.err (!%p882_p9)
}
  0x33   :  { %63 = dma.hbm_to_vmem [thread:$0]  %s1123_s7, 1024, %s58_s15, [#allocation6], %s939_s27, %s939_s27, %s940_s28  }
  0x34   :  { %s943_s19 = smov [#allocation8]   ;;  %s886_s23 = scalar_lea.hbm %s1125_s9, 1024 }
  0x35   :  { %s71_s20 = sshll.u32 %s943_s19, 4  ;;  %p887_p10 = scmp.ne.s32.totalorder %s1125_s9, %s886_s23  ;;  %s72_s20 = int_to_ptr.vmem [resolvable:$true] %s71_s20 }
  0x36   :  { %p890_p11 = scmp.lt.u32.totalorder %s886_s23, %s1125_s9 }
  0x38   :  { %p892_p12 = pnand %p890_p11, %p887_p10 }
  0x3a   :  { %895 = shalt.err (!%p892_p12)
}
  0x3b   :  { %s896_s26 = scalar_lea.vmem %s72_s20, 1024  ;;  %p901_p0 = scmp.lt.s32.totalorder %s72_s20, %s72_s20 }
  0x3c   :  { %p897_p13 = scmp.ne.s32.totalorder %s72_s20, %s896_s26  ;;  %p902_p1 = scmp.lt.s32.totalorder %s896_s26, %s896_s26 }
  0x3e   :  { %p903_p2 = por %p902_p1, %p901_p0 }
  0x40   :  { %p904_p3 = pnand %p903_p2, %p897_p13 }
  0x42   :  { %907 = shalt.err (!%p904_p3)
}
  0x43   :  { %77 = dma.hbm_to_vmem [thread:$0]  %s1125_s9, 1024, %s72_s20, [#allocation9], %s939_s27, %s939_s27, %s940_s28  }
  0x44   :  { %930 = dma.done.wait [#allocation3], 64  }
  0x45   :  { %931 = vsyncadd [#allocation3], 4294967232 }
  0x46   :  { %932 = dma.done.wait [#allocation6], 3072  }
  0x47   :  { %933 = vsyncadd [#allocation6], 4294964224 }
  0x48   :  { %934 = dma.done.wait [#allocation9], 1024  }
  0x49   :  { %935 = vsyncadd [#allocation9], 4294966272  ;;  %v944_v0 = vmov 0   ;;  %vm108_vm0 = vcmask 1043456   ;;  %v98_v1 = vld [vmem:[%s1119_s3] sm:$0xff]  ;;  %vm169_vm1 = vcmask 1041408   ;;  %v219_v35 = vlaneseq }
  0x4a   :  { %147 = vmatprep.mubr.bf16.mxu1 %v944_v0  ;;  %v95_v2 = vld [vmem:[%s1117_s1] sm:$0xff]  ;;  %v658_v3 = vld.sshfl [vmem:[#allocation2] sm:$0x33 pattern:$0x76325410]  ;;  %v655_v4 = vcombine.high %v98_v1, %v98_v1  ;;  %v654_v5 = vcombine.low %v98_v1, %v98_v1  ;;  %vm104_vm2 = vcmask 64512  }
  0x4b   :  { %v164_v6 = vcombine.high %v658_v3, %v658_v3  ;;  %v788_v7 = vld [vmem:[#allocation5 + $0x40] sm:$0xff]   ;;  %v96_v9 = vpack.c.bf16 %v95_v2, %v95_v2  ;;  %v790_v11 = vld [vmem:[#allocation5 + $0x48] sm:$0xff]   ;;  %v171_v12 = vsel %vm169_vm1, %v658_v3, 0  ;;  %v792_v15 = vld [vmem:[#allocation5 + $0x50] sm:$0xff]   ;;  %vm165_vm3 = vcmask 31744   ;;  %s947_s2 = smov [#allocation10]  }
  0x4c   :  { %656 = vmatprep.subr.msk.bf16.mxu1 %vm108_vm0, %v655_v4  ;;  %v110_v8 = vsel %vm108_vm0, %v654_v5, 0  ;;  %v789_v10 = vld [vmem:[#allocation5] sm:$0xff]   ;;  %696 = vmatprep.subr.bf16.mxu0 %v788_v7  ;;  %v791_v13 = vld [vmem:[#allocation5 + $0x8] sm:$0xff]   ;;  %v793_v16 = vld [vmem:[#allocation5 + $0x10] sm:$0xff]   ;;  %v945_v29 = vmov 0.0   ;;  %v220_v36 = vshrl.u32 %v219_v35, 7 }
  0x4d   :  { %116 = vmatpush1.bf16.msra.mxu1 %v110_v8  ;;  %697 = vmatpush3.bf16.msra.mxu0 %v789_v10  ;;  %v93_v14 = vld [vmem:[%s1116_s0] sm:$0xff]  ;;  %v794_v17 = vld [vmem:[#allocation5 + $0x58] sm:$0xff]   ;;  %v800_v24 = vld [vmem:[#allocation5 + $0x70] sm:$0xff]   ;;  %vm946_vm4 = vmmov 0   ;;  %s643_s13 = sshll.u32 %s947_s2, 4  ;;  %s644_s13 = int_to_ptr.vmem [resolvable:$true] %s643_s13 }
  0x4e   :  { %659 = vmatprep.subr.msk.bf16.mxu1 %vm169_vm1, %v164_v6  ;;  %698 = vmatprep.subr.bf16.mxu0 %v790_v11  ;;  %v94_v18 = vpack.c.bf16 %v93_v14, %v93_v14  ;;  %v795_v19 = vld [vmem:[#allocation5 + $0x18] sm:$0xff]   ;;  %v796_v20 = vld [vmem:[#allocation5 + $0x60] sm:$0xff]   ;;  %v798_v22 = vld [vmem:[#allocation5 + $0x68] sm:$0xff]   ;;  %v221_v41 = vsub.s32 0, %v220_v36  ;;  %v225_v43 = vsub.s32 1, %v220_v36  ;;  %p913_p5 = scmp.lt.s32.totalorder %s644_s13, %s644_s13 }
  0x4f   :  { %v797_v21 = vld [vmem:[#allocation5 + $0x20] sm:$0xff]   ;;  %v799_v23 = vld [vmem:[#allocation5 + $0x28] sm:$0xff]   ;;  %v801_v25 = vld [vmem:[#allocation5 + $0x30] sm:$0xff]  }
  0x50   :  { %657 = vmatmul.mubr.msk.bf16.vlgmr.msra.gmra.mrb[0].mxu1 %vm104_vm2, %v96_v9  ;;  %v802_v26 = vld [vmem:[#allocation5 + $0x78] sm:$0xff]   ;;  %v804_v28 = vld [vmem:[#allocation7] sm:$0xff]   ;;  %v805_v30 = vld [vmem:[#allocation7 + $0x8] sm:$0xff]  }
  0x51   :  { %177 = vmatpush1.bf16.msra.mxu1 %v171_v12  ;;  %208 = vmatprep.mubr.bf16.mxu1 %v944_v0  ;;  %v803_v27 = vld [vmem:[#allocation5 + $0x38] sm:$0xff]   ;;  %v806_v31 = vld [vmem:[#allocation7 + $0x10] sm:$0xff]   ;;  %v808_v33 = vld [vmem:[#allocation7 + $0x20] sm:$0xff]  }
  0x52   :  { %699 = vmatpush3.bf16.msra.mxu0 %v791_v13  ;;  %736 = vmatprep.subr.bf16.mxu1 %v945_v29  ;;  %v807_v32 = vld [vmem:[#allocation7 + $0x18] sm:$0xff]   ;;  %v809_v34 = vld [vmem:[#allocation7 + $0x28] sm:$0xff]   ;;  %v217_v42 = vld [vmem:[%s1120_s4] sm:$0x3] }
  0x53   :  { %700 = vmatprep.subr.bf16.mxu0 %v792_v15  ;;  %v222_v44 = vrot.slane %v217_v42, %v221_v41  ;;  %v226_v46 = vrot.slane %v217_v42, %v225_v43  ;;  %v810_v58 = vld [vmem:[#allocation7 + $0x30] sm:$0xff]   ;;  %v811_v59 = vld [vmem:[#allocation7 + $0x38] sm:$0xff]   ;;  %v812_v60 = vld [vmem:[#allocation8] sm:$0xff]  }
  0x54   :  { %v813_v61 = vld [vmem:[#allocation8 + $0x8] sm:$0xff]   ;;  %v814_v62 = vld [vmem:[#allocation8 + $0x10] sm:$0xff]   ;;  %v815_v63 = vld [vmem:[#allocation8 + $0x18] sm:$0xff]  }
  0x55   :  { %v816_v0 = vld [vmem:[#allocation8 + $0x20] sm:$0xff]   ;;  %v817_v1 = vld [vmem:[#allocation8 + $0x28] sm:$0xff]   ;;  %v818_v11 = vld [vmem:[#allocation8 + $0x30] sm:$0xff]  }
  0x56   :  { %701 = vmatpush3.bf16.msra.mxu0 %v793_v16  ;;  %v661_v3 = vld [vmem:[%s1122_s6] ss:$0 sm:$0xff]  ;;  %v819_v12 = vld [vmem:[#allocation8 + $0x38] sm:$0xff]  }
  0x57   :  { %702 = vmatprep.subr.bf16.mxu0 %v794_v17  ;;  %v678_v13 = vld [vmem:[%s1124_s8] ss:$0 sm:$0xff]  ;;  %s908_s8 = scalar_lea.vmem %s644_s13, 128 }
  0x58   :  { %660 = vmatmul.mubr.msk.bf16.vlgmr.msra.gmra.mrb[4].mxu1 %vm165_vm3, %v94_v18  ;;  %p909_p4 = scmp.ne.s32.totalorder %s644_s13, %s908_s8  ;;  %p914_p6 = scmp.lt.s32.totalorder %s908_s8, %s908_s8 }
  0x59   :  { %737 = vmatpush3.bf16.msra.mxu1 %v804_v28  ;;  %752 = vmatprep.mubr.msk.bf16.mxu1 %vm946_vm4, %v945_v29 }
  0x5a   :  { %703 = vmatpush3.bf16.msra.mxu0 %v795_v19  ;;  %738 = vmatprep.subr.bf16.mxu1 %v945_v29  ;;  %p915_p7 = por %p914_p6, %p913_p5 }
  0x5b   :  { %704 = vmatprep.subr.bf16.mxu0 %v796_v20 }
  0x5c   :  { %p916_p8 = pnand %p915_p7, %p909_p4 }
  0x5d   :  { %739 = vmatpush3.bf16.msra.mxu1 %v805_v30 }
  0x5e   :  { %705 = vmatpush3.bf16.msra.mxu0 %v797_v21  ;;  %740 = vmatprep.subr.bf16.mxu1 %v945_v29  ;;  %v687_v21 = vld [vmem:[%s1126_s10] ss:$0 sm:$0xff] }
  0x5f   :  { %706 = vmatprep.subr.bf16.mxu0 %v798_v22 }
  0x61   :  { %741 = vmatpush3.bf16.msra.mxu1 %v806_v31 }
  0x62   :  { %707 = vmatpush3.bf16.msra.mxu0 %v799_v23  ;;  %742 = vmatprep.subr.bf16.mxu1 %v945_v29 }
  0x63   :  { %708 = vmatprep.subr.bf16.mxu0 %v800_v24 }
  0x65   :  { %743 = vmatpush3.bf16.msra.mxu1 %v807_v32 }
  0x66   :  { %709 = vmatpush3.bf16.msra.mxu0 %v801_v25  ;;  %744 = vmatprep.subr.bf16.mxu1 %v945_v29 }
  0x67   :  { %710 = vmatprep.subr.bf16.mxu0 %v802_v26 }
  0x69   :  { %745 = vmatpush3.bf16.msra.mxu1 %v808_v33 }
  0x6a   :  { %711 = vmatpush3.bf16.msra.mxu0 %v803_v27  ;;  %746 = vmatprep.subr.bf16.mxu1 %v945_v29 }
  0x6b   :  { %756 = vmatprep.subr.bf16.mxu0 %v945_v29 }
  0x6d   :  { %747 = vmatpush3.bf16.msra.mxu1 %v809_v34 }
  0x6e   :  { %748 = vmatprep.subr.bf16.mxu1 %v945_v29 }
  0x71   :  { %749 = vmatpush3.bf16.msra.mxu1 %v810_v58 }
  0x72   :  { %750 = vmatprep.subr.bf16.mxu1 %v945_v29 }
  0x75   :  { %751 = vmatpush3.bf16.msra.mxu1 %v811_v59 }
 0x123   :  { %v149_v37 = vpop.f32.mrb[0].mxu1 }
 0x124   :  { %v151_v38 = vpop.f32.mrb[1].mxu1 }
 0x125   :  { %v153_v39 = vpop.f32.mrb[2].mxu1 }
 0x126   :  { %v154_v40 = vpop.f32.mrb[3].mxu1 }
 0x12b   :  { %v210_v45 = vpop.f32.mrb[4].mxu1 }
 0x12c   :  { %v211_v47 = vadd.f32 %v210_v45, %v149_v37  ;;  %v212_v48 = vpop.f32.mrb[5].mxu1 }
 0x12d   :  { %v213_v49 = vadd.f32 %v212_v48, %v151_v38  ;;  %v214_v50 = vpop.f32.mrb[6].mxu1 }
 0x12e   :  { %v229_v51 = vadd.f32 %v222_v44, %v211_v47  ;;  %v215_v52 = vpop.f32.mrb[7].mxu1 }
 0x12f   :  { %v230_v53 = vadd.f32 %v226_v46, %v213_v49 }
 0x130   :  { %v231_v54 = vmax.f32 %v229_v51, 0.0 }
 0x131   :  { %v232_v55 = vmax.f32 %v230_v53, 0.0 }
 0x132   :  { %v233_v57 = vpack.c.bf16 %v231_v54, %v231_v54 }
 0x133   :  { %v234_v56 = vpack.c.bf16 %v232_v55, %v232_v55 }
 0x135   :  { %402 = vmatprep.mubr.bf16.mxu0 %v234_v56 }
 0x136   :  { %403 = vmatmul.mubr.bf16.vlgmr.msra.gmra.mrb[0].mxu0 %v233_v57 }
 0x137   :  { %772 = vmatprep.mubr.msk.bf16.mxu0 %vm946_vm4, %v945_v29  ;;  %757 = vmatpush3.bf16.msra.mxu0 %v812_v60 }
 0x138   :  { %758 = vmatprep.subr.bf16.mxu0 %v945_v29 }
 0x13b   :  { %759 = vmatpush3.bf16.msra.mxu0 %v813_v61 }
 0x13c   :  { %760 = vmatprep.subr.bf16.mxu0 %v945_v29 }
 0x13f   :  { %761 = vmatpush3.bf16.msra.mxu0 %v814_v62 }
 0x140   :  { %762 = vmatprep.subr.bf16.mxu0 %v945_v29 }
 0x143   :  { %763 = vmatpush3.bf16.msra.mxu0 %v815_v63 }
 0x144   :  { %764 = vmatprep.subr.bf16.mxu0 %v945_v29 }
 0x147   :  { %765 = vmatpush3.bf16.msra.mxu0 %v816_v0 }
 0x148   :  { %766 = vmatprep.subr.bf16.mxu0 %v945_v29 }
 0x14b   :  { %767 = vmatpush3.bf16.msra.mxu0 %v817_v1 }
 0x14c   :  { %768 = vmatprep.subr.bf16.mxu0 %v945_v29 }
 0x14f   :  { %769 = vmatpush3.bf16.msra.mxu0 %v818_v11 }
 0x150   :  { %770 = vmatprep.subr.bf16.mxu0 %v945_v29 }
 0x153   :  { %771 = vmatpush3.bf16.msra.mxu0 %v819_v12 }
 0x209   :  { %v712_v2 = vpop.f32.mrb[0].mxu0 }
 0x20a   :  { %v713_v4 = vpop.f32.mrb[1].mxu0 }
 0x20b   :  { %v714_v5 = vadd.f32 %v713_v4, %v712_v2  ;;  %v715_v6 = vpop.f32.mrb[2].mxu0 }
 0x20c   :  { %v716_v7 = vpop.f32.mrb[3].mxu0 }
 0x20d   :  { %v405_v8 = vadd.f32 %v714_v5, %v661_v3 }
 0x20f   :  { %v410_v9 = vmax.f32 %v405_v8, 0.0 }
 0x211   :  { %v411_v10 = vpack.c.bf16 %v410_v9, %v410_v9 }
 0x213   :  { %753 = vmatmul.mubr.bf16.vlgmr.msra.gmra.mrb[8].mxu1 %v411_v10 }
 0x2e6   :  { %v517_v14 = vpop.f32.mrb[8].mxu1 }
 0x2e7   :  { %v518_v15 = vadd.f32 %v678_v13, %v517_v14  ;;  %v754_v16 = vpop.f32.mrb[9].mxu1 }
 0x2e8   :  { %v520_v17 = vpop.f32.mrb[10].mxu1 }
 0x2e9   :  { %v523_v18 = vmax.f32 %v518_v15, 0.0  ;;  %v755_v19 = vpop.f32.mrb[11].mxu1 }
 0x2eb   :  { %v524_v20 = vpack.c.bf16 %v523_v18, %v523_v18 }
 0x2ed   :  { %773 = vmatmul.mubr.bf16.vlgmr.msra.gmra.mrb[4].mxu0 %v524_v20 }
 0x3c0   :  { %v630_v22 = vpop.f32.mrb[4].mxu0 }
 0x3c1   :  { %v631_v23 = vadd.f32 %v687_v21, %v630_v22  ;;  %v774_v24 = vpop.f32.mrb[5].mxu0 }
 0x3c2   :  { %v633_v25 = vpop.f32.mrb[6].mxu0 }
 0x3c3   :  { %636 = vst [vmem:[#allocation10] sm:$0xff] %v631_v23  ;;  %v775_v26 = vpop.f32.mrb[7].mxu0 }
 0x3c4   :  { %919 = shalt.err (!%p916_p8)
}
 0x3c5   :  { %s920_s10 = scalar_lea.hbm %s1127_s11, 128 }
 0x3c6   :  { %p921_p9 = scmp.ne.s32.totalorder %s1127_s11, %s920_s10  ;;  %p924_p10 = scmp.lt.u32.totalorder %s920_s10, %s1127_s11 }
 0x3c8   :  { %p926_p11 = pnand %p924_p10, %p921_p9 }
 0x3ca   :  { %929 = shalt.err (!%p926_p11)
}
 0x3cb   :  { %646 = dma.vmem_to_hbm [thread:$0]  %s644_s13, 128, %s1127_s11, [#allocation4]  }
 0x3cc   :  { %936 = dma.done.wait [#allocation4], 128  }
 0x3cd   :  { %937 = vsyncadd [#allocation4], 4294967168 }
 0x3ce   :  { %650 = vsyncpa [#allocation3], 1 }
 0x3cf   :  { %651 = vsyncpa [#allocation6], 1 }
 0x3d0   :  { %652 = vsyncpa [#allocation9], 1 }
 0x3d1   :  { %653 = vsyncpa [#allocation4], 1 }

</bundles_post_ra>
